<compile_context>
chip_gen: v7x
topology: tpu7x:2x2x1
jax: 0.10.0
libtpu: 0.0.40
codegen_flags: <defaults>
</compile_context>

<pallas_src>
import functools

import jax
import jax.numpy as jnp
from jax.experimental import pallas as pl
from jax.experimental.pallas import tpu as pltpu


def _relu_kernel(x_ref, o_ref):
    # Elementwise max with 0 on the VPU.
    o_ref[...] = jnp.maximum(x_ref[...], jnp.zeros((), x_ref.dtype))


@functools.lru_cache(maxsize=None)
def _tpu_config():
    """Returns (target_block_bytes, vmem_limit_bytes, tensorcores_per_chip)."""
    kind = ""
    try:
        kind = jax.devices()[0].device_kind.lower()
    except Exception:  # pragma: no cover - defensive, keep one code path
        pass
    is_v7 = "v7" in kind

    vmem_cap = None
    try:
        vmem_cap = int(pltpu.get_tpu_info().vmem_capacity_bytes)
    except Exception:
        vmem_cap = None
    if vmem_cap is None:
        vmem_cap = (64 if is_v7 else 128) * 1024 * 1024

    # 2 TensorCores per chip on v7x; v5e/v6e expose a single core to Pallas.
    cores = 2 if is_v7 else 1

    if vmem_cap <= 64 * 1024 * 1024:
        # v7x-class: in+out double-buffered ~= 4x block -> keep under ~48 MiB.
        block_bytes = 12 * 1024 * 1024
        vmem_limit = 56 * 1024 * 1024
    else:
        # v5e/v6e-class (128 MiB physical VMEM): big streaming blocks; raise
        # the scoped limit well above the 16/32 MiB defaults.
        block_bytes = 16 * 1024 * 1024
        vmem_limit = 80 * 1024 * 1024
    return block_bytes, vmem_limit, cores


def _sublane_pack(dtype):
    itemsize = jnp.dtype(dtype).itemsize
    return max(8, 32 // max(itemsize, 1))  # 8 for 4B, 16 for 2B, 32 for 1B dtypes


def _choose_width(total):
    """Largest lane-dense slab width (multiple of 128) dividing `total`.

    Prefers a width that leaves >= 8 rows (fully populated sublanes);
    `total` is guaranteed to be a multiple of 128 by the caller.
    """
    fallback = 128
    for w in (16384, 8192, 4096, 2048, 1024, 512, 256, 128):
        if total % w == 0:
            if total // w >= 8:
                return w
            if fallback == 128:
                fallback = w
    return fallback


def _choose_rows(rows, width, itemsize, pack, block_bytes, cores):
    """Row tile from the per-generation VMEM block budget, sublane-pack aligned."""
    if rows <= pack:
        return rows  # full-extent block; satisfies the (8,128) rule via full-dim match
    budget_rows = max(pack, block_bytes // (width * itemsize))
    tr = max(pack, (budget_rows // pack) * pack)
    tr = min(tr, max(pack, (rows // pack) * pack))
    if cores >= 2:
        # Megacore: >= 2 grid steps per TensorCore keeps each core's BlockSpec
        # prefetch/writeback pipeline filled ...
        min_steps = 2 * cores
        while pl.cdiv(rows, tr) < min_steps and tr > pack:
            tr = max(pack, ((tr // 2) // pack) * pack)
        # ... and an even step count avoids the ragged last block landing
        # entirely on one core.
        steps = pl.cdiv(rows, tr)
        if steps > 1 and steps % 2 == 1 and tr > pack:
            tr_even = max(pack, ((pl.cdiv(rows, steps + 1) + pack - 1) // pack) * pack)
            if pl.cdiv(rows, tr_even) % 2 == 0:
                tr = tr_even
    return tr


def relu_pallas(x, *, donate_input=False):
    """ReLU(x) = clamp(x, min=0), computed in a Pallas TPU kernel.

    `donate_input=True` adds input/output aliasing (saves the output HBM
    allocation, never bandwidth); it is only effective if the caller actually
    donates `x` at the jit boundary (donate_argnums), otherwise XLA inserts a
    defensive copy and it becomes slower than the default.
    """
    orig_shape = x.shape
    dtype = x.dtype
    total = x.size
    if total == 0:
        return x

    itemsize = jnp.dtype(dtype).itemsize
    pack = _sublane_pack(dtype)
    block_bytes, vmem_limit, cores = _tpu_config()

    flat = x.reshape(-1)  # contiguous view, free

    if total % 128 == 0:
        width = _choose_width(total)
        rows = total // width
        x2 = flat.reshape(rows, width)  # free (contiguous view)
        tr = _choose_rows(rows, width, itemsize, pack, block_bytes, cores)
        grid = (pl.cdiv(rows, tr),)
        block = (tr, width)
    elif total * itemsize <= block_bytes:
        # Ragged element count but small: single full-extent block.
        # No padding, no extra HBM passes.
        rows, width = 1, total
        x2 = flat.reshape(rows, width)
        grid = (1,)
        block = (1, width)
    else:
        # TODO(synk): huge tensors whose element count is not a multiple of 128
        # would need a prefix kernel + scalar tail; fall back to a single fused
        # XLA pass instead of paying pad + slice copies (2 extra HBM passes).
        return jnp.maximum(x, jnp.zeros((), dtype))

    extra = {}
    if donate_input:
        extra["input_output_aliases"] = {0: 0}

    out = pl.pallas_call(
        _relu_kernel,
        out_shape=jax.ShapeDtypeStruct((rows, width), dtype),
        grid_spec=pltpu.PrefetchScalarGridSpec(
            num_scalar_prefetch=0,
            grid=grid,
            in_specs=[pl.BlockSpec(block, lambda i: (i, 0))],
            out_specs=pl.BlockSpec(block, lambda i: (i, 0)),
        ),
        compiler_params=pltpu.CompilerParams(
            dimension_semantics=("parallel",),
            vmem_limit_bytes=vmem_limit,
        ),
        cost_estimate=pl.CostEstimate(
            flops=int(total),
            transcendentals=0,
            bytes_accessed=int(2 * total * itemsize),
        ),
        **extra,
    )(x2)

    return out.reshape(orig_shape)


if __name__ == "__main__":
    key = jax.random.PRNGKey(0)

    # 1) Small NCHW-like activation (lane-dense slab path, total % 128 == 0).
    x = jax.random.normal(key, (2, 4, 16, 16), dtype=jnp.float32)
    y = jax.block_until_ready(relu_pallas(x))
    assert y.shape == x.shape and y.dtype == x.dtype
    assert jnp.allclose(y, jnp.maximum(x, 0.0)), "mismatch vs reference ReLU (case 1)"

    # 2) Row count that doesn't divide the tile (cdiv grid / masked tail block).
    x2 = jax.random.normal(jax.random.PRNGKey(0), (2, 4, 100, 32), dtype=jnp.float32)
    y2 = jax.block_until_ready(relu_pallas(x2))
    assert jnp.allclose(y2, jnp.maximum(x2, 0.0)), "mismatch vs reference ReLU (case 2)"

    # 3) Ragged total (single full-extent block path, no padding).
    x3 = jax.random.normal(jax.random.PRNGKey(0), (3, 5, 7), dtype=jnp.float32)
    y3 = jax.block_until_ready(relu_pallas(x3))
    assert jnp.allclose(y3, jnp.maximum(x3, 0.0)), "mismatch vs reference ReLU (case 3)"

    # 4) bf16 (exercises the 16-row sublane pack).
    x4 = jax.random.normal(jax.random.PRNGKey(0), (2, 4, 16, 16)).astype(jnp.bfloat16)
    y4 = jax.block_until_ready(relu_pallas(x4))
    assert y4.dtype == jnp.bfloat16
    assert jnp.array_equal(y4, jnp.maximum(x4, jnp.bfloat16(0))), "mismatch (case 4)"

    print("KERNEL_OK")
</pallas_src>

<mosaic_0001>
module attributes {stable_mosaic.version = 11 : i64} {
  func.func @_relu_kernel(%arg0: i32, %arg1: memref<8x256xf32, #tpu.memory_space<vmem>>, %arg2: memref<8x256xf32, #tpu.memory_space<vmem>>) attributes {dimension_semantics = [#tpu.dimension_semantics<parallel>], iteration_bounds = array<i64: 1>, scalar_prefetch = 0 : i64, scratch_operands = 0 : i64, tpu.core_type = #tpu.core_type<tc>, window_params = [{transform_indices = @transform_0, window_bounds = array<i64: 8, 256>}, {transform_indices = @transform_1, window_bounds = array<i64: 8, 256>}]} {
    %c0 = arith.constant 0 : index
    %c0_0 = arith.constant 0 : index
    %0 = vector.load %arg1[%c0, %c0_0] : memref<8x256xf32, #tpu.memory_space<vmem>>, vector<8x256xf32>
    %cst = arith.constant 0.000000e+00 : f32
    %1 = vector.broadcast %cst : f32 to vector<8x256xf32>
    %2 = arith.maximumf %0, %1 : vector<8x256xf32>
    %c0_1 = arith.constant 0 : index
    %c0_2 = arith.constant 0 : index
    %3 = vector.load %arg2[%c0_1, %c0_2] : memref<8x256xf32, #tpu.memory_space<vmem>>, vector<8x256xf32>
    tpu.vector_store %arg2[%c0_1, %c0_2], %2 {strides = array<i32>} : memref<8x256xf32, #tpu.memory_space<vmem>>, vector<8x256xf32>,
    return
  }
  func.func @transform_0(%arg0: i32) -> (i32, i32) {
    %c0_i32 = arith.constant 0 : i32
    %c0_i32_0 = arith.constant 0 : i32
    return %arg0, %c0_i32 : i32, i32
  }
  func.func @transform_1(%arg0: i32) -> (i32, i32) {
    %c0_i32 = arith.constant 0 : i32
    %c0_i32_0 = arith.constant 0 : i32
    return %arg0, %c0_i32 : i32, i32
  }
}

</mosaic_0001>

<bundles_post_ra>
// kernel: tpu_custom_call.1
= control target key start
LH: loop header
LB: loop body
LE: loop exit
PB: predicated region body
PF: predicated region fallthrough
CT: control target
= control target key end

     0   :  { %6 = vsyncpa [#allocation3], 0  ;;  %s128_s0 = inlined_call_operand.hbm [shape: f32[8,256], index: 0, kind: input, shape index: {}]   ;;  %s129_s1 = inlined_call_operand.hbm [shape: f32[8,256], index: 1, kind: output, shape index: {}]  }
   0x1   :  { %7 = vsyncpa [#allocation4], 0  ;;  %s92_s6 = smov [#allocation2]   ;;  %s44_s10 = scalar_lea.hbm %s128_s0, 256 }
   0x2   :  { %s14_s7 = sshll.u32 %s92_s6, 4  ;;  %p45_p0 = scmp.ne.s32.totalorder %s128_s0, %s44_s10  ;;  %s15_s7 = int_to_ptr.vmem [resolvable:$true] %s14_s7 }
   0x3   :  { %p48_p1 = scmp.lt.u32.totalorder %s44_s10, %s128_s0 }
   0x5   :  { %p50_p2 = pnand %p48_p1, %p45_p0 }
   0x7   :  { %53 = shalt.err (!%p50_p2)
}
   0x8   :  { %s54_s15 = scalar_lea.vmem %s15_s7, 256  ;;  %p59_p4 = scmp.lt.s32.totalorder %s15_s7, %s15_s7 }
   0x9   :  { %p55_p3 = scmp.ne.s32.totalorder %s15_s7, %s54_s15  ;;  %p60_p5 = scmp.lt.s32.totalorder %s54_s15, %s54_s15 }
   0xb   :  { %p61_p6 = por %p60_p5, %p59_p4 }
   0xd   :  { %p62_p7 = pnand %p61_p6, %p55_p3 }
   0xf   :  { %65 = shalt.err (!%p62_p7)
}
  0x10   :  { %17 = dma.hbm_to_vmem [thread:$0]  %s128_s0, 256, %s15_s7, [#allocation3]  }
  0x11   :  { %88 = dma.done.wait [#allocation3], 256  }
  0x12   :  { %89 = vsyncadd [#allocation3], 4294967040  ;;  %s93_s18 = smov [#allocation5]   ;;  %v21_v0 = vld [vmem:[#allocation2] sm:$0xff]  ;;  %v22_v1 = vld [vmem:[#allocation2 + $0x8] sm:$0xff] }
  0x13   :  { %s33_s19 = sshll.u32 %s93_s18, 4  ;;  %v23_v2 = vmax.f32 %v21_v0, 0.0  ;;  %v24_v3 = vmax.f32 %v22_v1, 0.0  ;;  %s34_s19 = int_to_ptr.vmem [resolvable:$true] %s33_s19 }
  0x14   :  { %s66_s20 = scalar_lea.vmem %s34_s19, 256  ;;  %p71_p9 = scmp.lt.s32.totalorder %s34_s19, %s34_s19 }
  0x15   :  { %25 = vst [vmem:[#allocation5] sm:$0xff] %v23_v2  ;;  %26 = vst [vmem:[#allocation5 + $0x8] sm:$0xff] %v24_v3  ;;  %p67_p8 = scmp.ne.s32.totalorder %s34_s19, %s66_s20  ;;  %p72_p10 = scmp.lt.s32.totalorder %s66_s20, %s66_s20 }
  0x17   :  { %p73_p11 = por %p72_p10, %p71_p9 }
  0x19   :  { %p74_p12 = pnand %p73_p11, %p67_p8 }
  0x1b   :  { %77 = shalt.err (!%p74_p12)
}
  0x1c   :  { %s78_s22 = scalar_lea.hbm %s129_s1, 256 }
  0x1d   :  { %p79_p13 = scmp.ne.s32.totalorder %s129_s1, %s78_s22  ;;  %p82_p0 = scmp.lt.u32.totalorder %s78_s22, %s129_s1 }
  0x1f   :  { %p84_p1 = pnand %p82_p0, %p79_p13 }
  0x21   :  { %87 = shalt.err (!%p84_p1)
}
  0x22   :  { %36 = dma.vmem_to_hbm [thread:$0]  %s34_s19, 256, %s129_s1, [#allocation4]  }
  0x23   :  { %90 = dma.done.wait [#allocation4], 256  }
  0x24   :  { %91 = vsyncadd [#allocation4], 4294967040 }
  0x25   :  { %40 = vsyncpa [#allocation3], 1 }
  0x26   :  { %41 = vsyncpa [#allocation4], 1 }

</bundles_post_ra>
